<compile_context>
chip_gen: v5e
topology: v5e:2x2
jax: 0.10.0
libtpu: 0.0.40
codegen_flags: <defaults>
</compile_context>

<pallas_src>
import math

import jax
import jax.numpy as jnp
from jax.experimental import pallas as pl
from jax.experimental.pallas import tpu as pltpu


# ---------------------------------------------------------------------------
# Parameter / buffer construction (deterministic, mirrors __init__)
# ---------------------------------------------------------------------------
def build_pe_table(max_len: int, d_model: int):
    """Base sinusoid table pe: (max_len, d_model).

    rowPE[i, j, :] = pe[j]   (depends on second index)
    colPE[i, j, :] = pe[i]   (= rowPE.transpose(1, 0))
    The full (max_len, max_len, d_model) broadcasts are never materialized.
    """
    assert d_model % 2 == 0, "d_model must be even (matches 0::2 / 1::2 fill)"
    position = jnp.arange(max_len, dtype=jnp.float32)[:, None]            # (L, 1)
    div_term = jnp.exp(
        jnp.arange(0, d_model, 2, dtype=jnp.float32)
        * (-math.log(10000.0) / d_model)
    )                                                                     # (D/2,)
    ang = position * div_term                                             # (L, D/2)
    pe = jnp.zeros((max_len, d_model), dtype=jnp.float32)
    pe = pe.at[:, 0::2].set(jnp.sin(ang))
    pe = pe.at[:, 1::2].set(jnp.cos(ang))
    return pe


def build_pe_sum(pe_table, s: int, dim: int, dtype=jnp.float32):
    """Pre-summed rowPE+colPE, hoisted out of the per-call forward path.

    pe_sum[i*s + j, :] = colPE[i, j] + rowPE[i, j] = pe[i] + pe[j].
    Shape (s*s, dim).  If the model runs bf16, pass dtype=jnp.bfloat16 and a
    bf16 x — the kernel is HBM-bound, so halving bytes is ~2x wall clock.
    """
    assert s <= pe_table.shape[0] and dim <= pe_table.shape[1]
    pe = pe_table[:s, :dim]
    return (pe[:, None, :] + pe[None, :, :]).reshape(s * s, dim).astype(dtype)


# ---------------------------------------------------------------------------
# VMEM budgeting / tile selection
# ---------------------------------------------------------------------------
def _vmem_sizes():
    """(physical_vmem_bytes, live_buffer_budget_bytes), per generation."""
    try:
        phys = int(pltpu.get_tpu_info().vmem_capacity_bytes)
    except Exception:
        phys = 64 << 20           # v7x worst case: 64 MiB per TensorCore
    return phys, phys // 2        # budget: 64 MiB on v5e/v6e, 32 MiB on v7x


def _choose_b_tile(bs: int, max_rows: int) -> int:
    """Largest sublane-aligned divisor of bs that fits, preferring >= 2 tiles."""
    best = 0
    upper = min(bs - 1, max_rows)   # d < bs  ->  >= 2 grid steps (v7x: 2 TCs)
    d = 8
    while d <= upper:
        if bs % d == 0:
            best = d
        d += 8
    if best:
        return best
    if bs <= max_rows or bs <= 8:
        return bs                   # single full tile: block dim == array dim
    # Rare fallback: ragged last block (masked stores on the tail tile only).
    return max(8, (min(bs, max_rows) // 8) * 8)


def _choose_tiles(bs: int, n: int, itemsize: int, budget: int):
    """Pick (b_tile, n_tile) so ~4 double-buffered blocks + pe fit the budget."""
    max_block_bytes = max(1, budget // 5)   # 2x in + 2x out blocks + slack
    n_tile = n                              # lane-dense full rows by default
    max_rows = max(1, max_block_bytes // (n_tile * itemsize))
    if max_rows < 8 and bs > max_rows:
        # Rows too wide: tile the lane axis into a large multiple of 128 that
        # divides n (keeps stores unmasked) so >= 8 sublane rows fit the budget.
        target_lanes = max(128, max_block_bytes // (8 * itemsize))
        best = 0
        d = 128
        limit = min(n, target_lanes)
        while d <= limit:
            if n % d == 0:
                best = d
            d += 128
        if best:
            n_tile = best
            max_rows = max(1, max_block_bytes // (n_tile * itemsize))
        # else: no suitable 128-multiple divisor of n; keep full width and rely
        # on the explicit vmem_limit headroom below (best effort).
    b_tile = _choose_b_tile(bs, max_rows)
    return b_tile, n_tile


# ---------------------------------------------------------------------------
# Pallas kernel: elementwise x + pe_sum (the forward hot path)
# ---------------------------------------------------------------------------
def _pe_add_kernel(x_ref, pe_ref, o_ref):
    # x_ref:  (B_TILE, N_TILE)   batch-row tile, lane-dense
    # pe_ref: (1, N_TILE)        pre-summed rowPE+colPE slice
    # o_ref:  (B_TILE, N_TILE)
    o_ref[...] = x_ref[...] + pe_ref[...]   # (1, N) broadcasts over sublanes


def positional_encoding_forward(x, pe_sum, *, donate_x=False):
    """x: (bs, gs, dim); pe_sum: (gs, dim) from build_pe_sum (hoisted)."""
    bs, gs, dim = x.shape
    assert pe_sum.shape == (gs, dim), "pe_sum must be pre-built for (gs, dim)"

    # Lane-dense flattening: last block dim is the (128-multiple-friendly)
    # full row width unless the wide-row fallback tiles it.
    n = gs * dim
    itemsize = jnp.dtype(x.dtype).itemsize
    x2 = x.reshape(bs, n)
    pe2 = pe_sum.astype(x.dtype).reshape(1, n)

    phys_vmem, budget = _vmem_sizes()
    b_tile, n_tile = _choose_tiles(bs, n, itemsize, budget)
    grid = (pl.cdiv(bs, b_tile), n // n_tile)

    # Explicit scoped-VMEM limit: actual live bytes + headroom, floored at the
    # universally-safe 16 MiB and capped at 3/4 of physical VMEM.
    block_bytes = b_tile * n_tile * itemsize
    required = 4 * block_bytes + 2 * n_tile * itemsize
    vmem_limit = int(min(phys_vmem * 3 // 4, max(required + (4 << 20), 16 << 20)))

    out = pl.pallas_call(
        _pe_add_kernel,
        out_shape=jax.ShapeDtypeStruct((bs, n), x2.dtype),
        grid_spec=pltpu.PrefetchScalarGridSpec(
            num_scalar_prefetch=0,
            grid=grid,
            in_specs=[
                pl.BlockSpec((b_tile, n_tile), lambda b, j: (b, j)),
                # pe row: constant along the batch axis, re-used across steps.
                pl.BlockSpec((1, n_tile), lambda b, j: (0, j)),
            ],
            out_specs=pl.BlockSpec((b_tile, n_tile), lambda b, j: (b, j)),
        ),
        compiler_params=pltpu.CompilerParams(
            dimension_semantics=("parallel", "parallel"),
            vmem_limit_bytes=vmem_limit,
        ),
        input_output_aliases=({0: 0} if donate_x else {}),
    )(x2, pe2)
    return out.reshape(bs, gs, dim)


# ---------------------------------------------------------------------------
# Reference (pure JAX) for correctness check — mirrors the PyTorch forward
# ---------------------------------------------------------------------------
def positional_encoding_reference(x, pe_table):
    bs, gs, dim = x.shape
    s = int(math.isqrt(gs))
    rowPE = jnp.broadcast_to(pe_table[None, :s, :dim], (s, s, dim))  # pe[j]
    colPE = jnp.broadcast_to(pe_table[:s, None, :dim], (s, s, dim))  # pe[i]
    feat = x.reshape(bs, s, s, dim) + rowPE[None] + colPE[None]
    return feat.reshape(bs, gs, dim)


if __name__ == "__main__":
    # Module hyper-params (small, consistent with forward semantics).
    d_model = 32
    max_len = 50
    dropout_p = 0.1  # identity at inference

    # Input: bs=2, gs=16 (s=4), dim=d_model.
    bs, gs, dim = 2, 16, d_model
    s = int(math.isqrt(gs))
    key = jax.random.PRNGKey(0)
    x = jax.random.normal(key, (bs, gs, dim), dtype=jnp.float32)

    pe_table = build_pe_table(max_len, d_model)
    pe_sum = build_pe_sum(pe_table, s, dim, dtype=x.dtype)   # hoisted, built once

    out = positional_encoding_forward(x, pe_sum)
    out = jax.block_until_ready(out)

    ref = positional_encoding_reference(x, pe_table)
    assert out.shape == (bs, gs, dim)
    assert jnp.allclose(out, ref, atol=1e-6, rtol=1e-6), "mismatch vs reference"

    print("KERNEL_OK")
</pallas_src>

<mosaic_0001>
module attributes {stable_mosaic.version = 11 : i64} {
  func.func @_pe_add_kernel(%arg0: i32, %arg1: i32, %arg2: memref<2x512xf32, #tpu.memory_space<vmem>>, %arg3: memref<1x512xf32, #tpu.memory_space<vmem>>, %arg4: memref<2x512xf32, #tpu.memory_space<vmem>>) attributes {dimension_semantics = [#tpu.dimension_semantics<parallel>, #tpu.dimension_semantics<parallel>], iteration_bounds = array<i64: 1, 1>, scalar_prefetch = 0 : i64, scratch_operands = 0 : i64, tpu.core_type = #tpu.core_type<tc>, window_params = [{transform_indices = @transform_0, window_bounds = array<i64: 2, 512>}, {transform_indices = @transform_1, window_bounds = array<i64: 1, 512>}, {transform_indices = @transform_2, window_bounds = array<i64: 2, 512>}]} {
    %c0 = arith.constant 0 : index
    %c0_0 = arith.constant 0 : index
    %0 = vector.load %arg2[%c0, %c0_0] : memref<2x512xf32, #tpu.memory_space<vmem>>, vector<2x512xf32>
    %c0_1 = arith.constant 0 : index
    %c0_2 = arith.constant 0 : index
    %1 = vector.load %arg3[%c0_1, %c0_2] : memref<1x512xf32, #tpu.memory_space<vmem>>, vector<1x512xf32>
    %2 = vector.broadcast %1 : vector<1x512xf32> to vector<2x512xf32>
    %3 = arith.addf %0, %2 : vector<2x512xf32>
    %c0_3 = arith.constant 0 : index
    %c0_4 = arith.constant 0 : index
    %4 = vector.load %arg4[%c0_3, %c0_4] : memref<2x512xf32, #tpu.memory_space<vmem>>, vector<2x512xf32>
    tpu.vector_store %arg4[%c0_3, %c0_4], %3 {strides = array<i32>} : memref<2x512xf32, #tpu.memory_space<vmem>>, vector<2x512xf32>,
    return
  }
  func.func @transform_0(%arg0: i32, %arg1: i32) -> (i32, i32) {
    %c0_i32 = arith.constant 0 : i32
    return %arg0, %arg1 : i32, i32
  }
  func.func @transform_1(%arg0: i32, %arg1: i32) -> (i32, i32) {
    %c0_i32 = arith.constant 0 : i32
    %c0_i32_0 = arith.constant 0 : i32
    return %c0_i32, %arg1 : i32, i32
  }
  func.func @transform_2(%arg0: i32, %arg1: i32) -> (i32, i32) {
    %c0_i32 = arith.constant 0 : i32
    return %arg0, %arg1 : i32, i32
  }
}

</mosaic_0001>

<bundles_post_ra>
// kernel: tpu_custom_call.1
= control target key start
LH: loop header
LB: loop body
LE: loop exit
PB: predicated region body
PF: predicated region fallthrough
CT: control target
= control target key end

     0   :  { %7 = vsyncpa [#allocation3], 0  ;;  %s185_s0 = inlined_call_operand.hbm [shape: f32[2,512], index: 0, kind: input, shape index: {}]   ;;  %s186_s1 = inlined_call_operand.hbm [shape: f32[1,512], index: 1, kind: input, shape index: {}]   ;;  %s187_s2 = inlined_call_operand.hbm [shape: f32[2,512], index: 2, kind: output, shape index: {}]  }
   0x1   :  { %8 = vsyncpa [#allocation6], 0 }
   0x2   :  { %9 = vsyncpa [#allocation4], 0  ;;  %s15_s11 = sshll.u32 %s185_s0, 4  ;;  %s158_s12 = smov [#allocation2]   ;;  %s16_s11 = int_to_ptr.hbm [resolvable:$true] %s15_s11 }
   0x3   :  { %s17_s13 = sshll.u32 %s158_s12, 4  ;;  %s26_s16 = sshll.u32 %s186_s1, 4  ;;  %s18_s13 = int_to_ptr.vmem [resolvable:$true] %s17_s13  ;;  %s27_s16 = int_to_ptr.hbm [resolvable:$true] %s26_s16 }
   0x4   :  { %20 = dma.hbm_to_vmem [thread:$0]  %s16_s11, 128, %s18_s13, [#allocation3]  }
   0x5   :  { %s159_s17 = smov [#allocation5]  }
   0x6   :  { %s28_s18 = sshll.u32 %s159_s17, 4  ;;  %s29_s18 = int_to_ptr.vmem [resolvable:$true] %s28_s18 }
   0x7   :  { %31 = dma.hbm_to_vmem [thread:$0]  %s27_s16, 64, %s29_s18, [#allocation6]  }
   0x8   :  { %152 = dma.done.wait [#allocation3], 128  }
   0x9   :  { %153 = vsyncadd [#allocation3], 4294967168 }
   0xa   :  { %154 = dma.done.wait [#allocation6], 64  }
   0xb   :  { %155 = vsyncadd [#allocation6], 4294967232  ;;  %v41_v0 = vld [vmem:[#allocation5] sm:$0xf]  ;;  %vm50_vm0 = vcmask 1041408   ;;  %vm52_vm1 = vcmask 1045508  }
   0xc   :  { %v43_v1 = vperm.slane %v41_v0, 0  ;;  %v44_v2 = vperm.slane %v41_v0, 1  ;;  %v45_v3 = vperm.slane %v41_v0, 2  ;;  %v46_v4 = vperm.slane %v41_v0, 3  ;;  %v40_v8 = vld [vmem:[#allocation2] sm:$0xff]  ;;  %s160_s0 = smov [#allocation7]  }
   0xd   :  { %vm54_vm2 = vcmask 1043456   ;;  %s64_s1 = sshll.u32 %s160_s0, 4  ;;  %s66_s21 = sshll.u32 %s187_s2, 4  ;;  %s65_s1 = int_to_ptr.vmem [resolvable:$true] %s64_s1  ;;  %s67_s21 = int_to_ptr.hbm [resolvable:$true] %s66_s21 }
   0xe   :  { %v47_v5 = vrot.slane %v44_v2, 6  ;;  %v48_v6 = vrot.slane %v45_v3, 4  ;;  %v49_v7 = vrot.slane %v46_v4, 2 }
  0x10   :  { %v51_v9 = vsel %vm50_vm0, %v43_v1, %v47_v5  ;;  %v53_v10 = vsel %vm52_vm1, %v48_v6, %v49_v7 }
  0x11   :  { %v55_v11 = vsel %vm54_vm2, %v51_v9, %v53_v10 }
  0x12   :  { %v57_v12 = vadd.f32 %v55_v11, %v40_v8 }
  0x14   :  { %58 = vst [vmem:[#allocation7] sm:$0xff] %v57_v12 }
  0x15   :  { %69 = dma.vmem_to_hbm [thread:$0]  %s65_s1, 128, %s67_s21, [#allocation4]  }
  0x16   :  { %156 = dma.done.wait [#allocation4], 128  }
  0x17   :  { %157 = vsyncadd [#allocation4], 4294967168 }
  0x18   :  { %74 = vsyncpa [#allocation3], 1 }
  0x19   :  { %75 = vsyncpa [#allocation6], 1 }
  0x1a   :  { %76 = vsyncpa [#allocation4], 1 }

</bundles_post_ra>
